<compile_context>
chip_gen: v5e
topology: v5e:2x2
jax: 0.10.0
libtpu: 0.0.40
codegen_flags: <defaults>
</compile_context>

<pallas_src>
import jax
import jax.numpy as jnp
from jax import lax
from jax.experimental import pallas as pl
from jax.experimental.pallas import tpu as pltpu

_INV_SQRT2 = 0.7071067811865476
_TM_CANDIDATES = (1024, 768, 512, 384, 256, 192, 128, 96, 64, 48, 32, 24, 16, 8)


def _round_up(x, m):
    return ((x + m - 1) // m) * m


def _vmem_capacity_bytes():
    try:
        return int(pltpu.get_tpu_info().vmem_capacity_bytes)
    except Exception:
        return 64 * 1024 * 1024  # conservative: v7x per-TensorCore VMEM


def _gelu_exact(h):
    # exact GELU (erf), f32.  Only switch to the tanh-approx (EUP) form if a
    # bundle dump shows the VALU slot saturating.
    return 0.5 * h * (1.0 + lax.erf(h * jnp.float32(_INV_SQRT2)))


# ---------------------------------------------------------------------------
# kernels
# ---------------------------------------------------------------------------

def _ffn_resident_kernel(x_ref, w1_ref, b1_ref, w2_ref, b2_ref, o_ref):
    """Whole FFN per token tile; W1/W2 fully resident in VMEM (fetched once)."""
    x = x_ref[...].astype(w1_ref.dtype)          # in-kernel bf16 cast of x
    h = jnp.dot(x, w1_ref[...], preferred_element_type=jnp.float32)
    h = _gelu_exact(h + b1_ref[...])
    y = jnp.dot(h.astype(w2_ref.dtype), w2_ref[...],
                preferred_element_type=jnp.float32)
    # dropout (eval mode) == identity.
    o_ref[...] = (y + b2_ref[...]).astype(o_ref.dtype)


def _ffn_streaming_kernel(x_ref, w1_ref, b1_ref, w2_ref, b2_ref, o_ref, acc_ref):
    """Hidden dim streamed: grid = (token tiles, hidden tiles), reduction last."""
    j = pl.program_id(1)

    @pl.when(j == 0)
    def _():
        acc_ref[...] = jnp.zeros_like(acc_ref)

    x = x_ref[...].astype(w1_ref.dtype)
    h = jnp.dot(x, w1_ref[...], preferred_element_type=jnp.float32)
    h = _gelu_exact(h + b1_ref[...])
    acc_ref[...] += jnp.dot(h.astype(w2_ref.dtype), w2_ref[...],
                            preferred_element_type=jnp.float32)

    @pl.when(j == pl.num_programs(1) - 1)
    def _():
        # add c_proj bias exactly once; dropout (eval mode) == identity.
        o_ref[...] = (acc_ref[...] + b2_ref[...]).astype(o_ref.dtype)


# ---------------------------------------------------------------------------
# wrapper
# ---------------------------------------------------------------------------

def prepare_ffn_params(w1, b1, w2, b2, *, compute_dtype=jnp.bfloat16,
                       force_streaming=False):
    """One-time weight prep (pad + bf16 cast), hoisted out of the call path.

    Weights are stored (in_features, out_features), i.e. transposed relative
    to PyTorch nn.Linear's (out, in): y = x @ W + b.
    """
    D, H = w1.shape
    assert w2.shape == (H, D) and b1.shape == (H,) and b2.shape == (D,)
    wb = jnp.dtype(compute_dtype).itemsize

    capacity = _vmem_capacity_bytes()
    budget = int(0.75 * capacity)

    Dp = _round_up(D, 128)
    Hp_res = _round_up(H, 128)
    # resident weights are still double-buffered by the pipeline machinery,
    # so count them twice when deciding whether they "fit".
    resident_bytes = 2 * (2 * Dp * Hp_res * wb + Hp_res * 4 + Dp * 4)
    resident = (not force_streaming) and resident_bytes <= int(0.45 * budget)

    if resident:
        Hp, th = Hp_res, Hp_res
    else:
        Hp = _round_up(H, 512)          # never fall back to th = H
        th = min(512, Hp)

    w1p = jnp.pad(w1, ((0, Dp - D), (0, Hp - H))) if (Dp != D or Hp != H) else w1
    w2p = jnp.pad(w2, ((0, Hp - H), (0, Dp - D))) if (Dp != D or Hp != H) else w2
    b1p = jnp.pad(b1, (0, Hp - H)) if Hp != H else b1
    b2p = jnp.pad(b2, (0, Dp - D)) if Dp != D else b2

    return dict(
        w1=w1p.astype(compute_dtype),
        w2=w2p.astype(compute_dtype),
        b1=b1p.reshape(1, Hp).astype(jnp.float32),
        b2=b2p.reshape(1, Dp).astype(jnp.float32),
        D=D, H=H, Dp=Dp, Hp=Hp, th=th,
        resident=resident, budget=budget, capacity=capacity,
        compute_dtype=compute_dtype,
    )


def ffn_forward(x, params):
    """x: (..., D) in its original dtype; params from prepare_ffn_params."""
    D, Dp, Hp, th = params["D"], params["Dp"], params["Hp"], params["th"]
    resident = params["resident"]
    budget, capacity = params["budget"], params["capacity"]
    w1p, b1p, w2p, b2p = params["w1"], params["b1"], params["w2"], params["b2"]
    wb = jnp.dtype(params["compute_dtype"]).itemsize

    assert x.shape[-1] == D
    lead = x.shape[:-1]
    M = 1
    for s in lead:
        M *= s
    out_dtype = x.dtype
    xb = jnp.dtype(x.dtype).itemsize
    ob = jnp.dtype(out_dtype).itemsize

    # ---- token tile from the per-generation VMEM budget --------------------
    if resident:
        fixed = 2 * (2 * Dp * Hp * wb + Hp * 4 + Dp * 4)       # resident weights (2x buf)
        per_row = (2 * Dp * xb + 2 * Dp * ob                   # double-buffered x / out
                   + Dp * wb + Dp * 4                          # bf16 x cast, f32 result
                   + Hp * 4 + Hp * wb)                         # f32 + bf16 hidden
    else:
        fixed = 2 * (2 * Dp * th * wb + th * 4 + Dp * 4)       # streamed W1/W2/b1 tiles
        per_row = (Dp * xb + Dp * ob                           # single-buffered x / out
                   + Dp * 4                                    # f32 accumulator scratch
                   + Dp * wb + Dp * 4                          # bf16 x cast, f32 partial
                   + th * 4 + th * wb)                         # f32 + bf16 hidden tile

    tm = 8
    cap = _round_up(M, 8)
    for t in _TM_CANDIDATES:
        if t <= cap and fixed + t * per_row <= budget:
            tm = t
            break
    # keep >= 2 token tiles so both v7x TensorCores get work on the parallel axis
    while tm > 8 and pl.cdiv(M, tm) < 2:
        tm = max(8, (tm // 2 // 8) * 8)

    Mp = _round_up(M, tm)
    n_i = Mp // tm
    vmem_limit = int(min(max(int(1.25 * (fixed + tm * per_row)), 32 * 1024 * 1024),
                         int(0.85 * capacity)))

    # ---- activations: no dtype pass; pad only if actually needed -----------
    x2 = x.reshape(M, D)
    if Mp != M or Dp != D:
        x2 = jnp.pad(x2, ((0, Mp - M), (0, Dp - D)))

    flops = 4 * Mp * Dp * Hp            # two matmuls
    trans = Mp * Hp                     # erf
    if resident:
        weight_reads = 2 * Dp * Hp * wb + Hp * 4
    else:
        weight_reads = n_i * (2 * Dp * Hp * wb + Hp * 4)       # re-read per token tile
    cost = pl.CostEstimate(
        flops=int(flops), transcendentals=int(trans),
        bytes_accessed=int(Mp * Dp * (xb + ob) + weight_reads + Dp * 4),
    )

    if resident:
        out = pl.pallas_call(
            _ffn_resident_kernel,
            out_shape=jax.ShapeDtypeStruct((Mp, Dp), out_dtype),
            grid_spec=pltpu.PrefetchScalarGridSpec(
                num_scalar_prefetch=0,
                grid=(n_i,),
                in_specs=[
                    pl.BlockSpec((tm, Dp), lambda i: (i, 0)),   # x token tile
                    pl.BlockSpec((Dp, Hp), lambda i: (0, 0)),   # W1 (resident, DMA'd once)
                    pl.BlockSpec((1, Hp), lambda i: (0, 0)),    # b1
                    pl.BlockSpec((Hp, Dp), lambda i: (0, 0)),   # W2 (resident)
                    pl.BlockSpec((1, Dp), lambda i: (0, 0)),    # b2
                ],
                out_specs=pl.BlockSpec((tm, Dp), lambda i: (i, 0)),
            ),
            compiler_params=pltpu.CompilerParams(
                dimension_semantics=("parallel",),
                vmem_limit_bytes=vmem_limit,
            ),
            cost_estimate=cost,
        )(x2, w1p, b1p, w2p, b2p)
    else:
        def build(single_buffer_io):
            io_kw = dict(pipeline_mode=pl.Buffered(1)) if single_buffer_io else {}
            return pl.pallas_call(
                _ffn_streaming_kernel,
                out_shape=jax.ShapeDtypeStruct((Mp, Dp), out_dtype),
                grid_spec=pltpu.PrefetchScalarGridSpec(
                    num_scalar_prefetch=0,
                    grid=(n_i, Hp // th),
                    in_specs=[
                        pl.BlockSpec((tm, Dp), lambda i, j: (i, 0), **io_kw),  # x
                        pl.BlockSpec((Dp, th), lambda i, j: (0, j)),           # W1 col tile
                        pl.BlockSpec((1, th), lambda i, j: (0, j)),            # b1 tile
                        pl.BlockSpec((th, Dp), lambda i, j: (j, 0)),           # W2 row tile
                        pl.BlockSpec((1, Dp), lambda i, j: (0, 0)),            # b2
                    ],
                    out_specs=pl.BlockSpec((tm, Dp), lambda i, j: (i, 0), **io_kw),
                    scratch_shapes=[pltpu.VMEM((tm, Dp), jnp.float32)],
                ),
                compiler_params=pltpu.CompilerParams(
                    dimension_semantics=("parallel", "arbitrary"),
                    vmem_limit_bytes=vmem_limit,
                ),
                cost_estimate=cost,
            )
        try:
            # x / out block indices only change with i (once per Hp//th steps):
            # a second buffer buys nothing, so single-buffer them to free VMEM.
            out = jax.block_until_ready(build(True)(x2, w1p, b1p, w2p, b2p))
        except Exception:
            # pl.Buffered(1) not accepted by this jax/Mosaic -> default buffering.
            out = build(False)(x2, w1p, b1p, w2p, b2p)

    if Mp != M or Dp != D:
        out = out[:M, :D]
    return out.reshape(*lead, D)


def reference_ffn(x, w1, b1, w2, b2):
    h = jnp.einsum("...d,dh->...h", x, w1) + b1
    h = 0.5 * h * (1.0 + lax.erf(h / jnp.sqrt(2.0)))
    return jnp.einsum("...h,hd->...d", h, w2) + b2


if __name__ == "__main__":
    key = jax.random.PRNGKey(0)

    def make_case(k, B, T, d_model):
        hidden = 4 * d_model
        k_x, k_w1, k_b1, k_w2, k_b2 = jax.random.split(k, 5)
        x = jax.random.normal(k_x, (B, T, d_model), dtype=jnp.float32)
        w1 = jax.random.normal(k_w1, (d_model, hidden), dtype=jnp.float32) * 0.02
        b1 = jax.random.normal(k_b1, (hidden,), dtype=jnp.float32) * 0.02
        w2 = jax.random.normal(k_w2, (hidden, d_model), dtype=jnp.float32) * 0.02
        b2 = jax.random.normal(k_b2, (d_model,), dtype=jnp.float32) * 0.02
        return x, w1, b1, w2, b2

    k1, k2 = jax.random.split(key)

    # case 1: module config d_model=32, p_dropout=0.1 (eval mode -> identity);
    # weights fit VMEM -> resident-weight kernel, weights DMA'd once.
    x, w1, b1, w2, b2 = make_case(k1, B=2, T=8, d_model=32)
    params = prepare_ffn_params(w1, b1, w2, b2)       # one-time prep (hoisted)
    out = jax.block_until_ready(ffn_forward(x, params))
    ref = jax.block_until_ready(reference_ffn(x, w1, b1, w2, b2))
    assert out.shape == x.shape
    assert params["resident"]
    # bf16 MXU inputs with f32 accumulation -> relaxed tolerance vs f32 reference.
    assert jnp.allclose(out, ref, atol=2e-2, rtol=2e-2), "resident-mode mismatch"

    # case 2: force the streaming (hidden-reduction) path so the accumulator /
    # pl.when init-finalize / parallel token axis code is exercised too.
    x, w1, b1, w2, b2 = make_case(k2, B=2, T=64, d_model=256)
    params = prepare_ffn_params(w1, b1, w2, b2, force_streaming=True)
    out = jax.block_until_ready(ffn_forward(x, params))
    ref = jax.block_until_ready(reference_ffn(x, w1, b1, w2, b2))
    assert out.shape == x.shape
    assert not params["resident"]
    assert jnp.allclose(out, ref, atol=2e-2, rtol=2e-2), "streaming-mode mismatch"

    print("KERNEL_OK")
</pallas_src>

<mosaic_0001>
module attributes {stable_mosaic.version = 11 : i64} {
  func.func @_ffn_resident_kernel(%arg0: i32, %arg1: memref<8x128xf32, #tpu.memory_space<vmem>>, %arg2: memref<128x128xbf16, #tpu.memory_space<vmem>>, %arg3: memref<1x128xf32, #tpu.memory_space<vmem>>, %arg4: memref<128x128xbf16, #tpu.memory_space<vmem>>, %arg5: memref<1x128xf32, #tpu.memory_space<vmem>>, %arg6: memref<8x128xf32, #tpu.memory_space<vmem>>) attributes {dimension_semantics = [#tpu.dimension_semantics<parallel>], iteration_bounds = array<i64: 2>, scalar_prefetch = 0 : i64, scratch_operands = 0 : i64, tpu.core_type = #tpu.core_type<tc>, window_params = [{transform_indices = @transform_0, window_bounds = array<i64: 8, 128>}, {pipeline_mode = #tpu.pipeline_mode<synchronous>, transform_indices = @transform_1, window_bounds = array<i64: 128, 128>}, {pipeline_mode = #tpu.pipeline_mode<synchronous>, transform_indices = @transform_2, window_bounds = array<i64: 1, 128>}, {pipeline_mode = #tpu.pipeline_mode<synchronous>, transform_indices = @transform_3, window_bounds = array<i64: 128, 128>}, {pipeline_mode = #tpu.pipeline_mode<synchronous>, transform_indices = @transform_4, window_bounds = array<i64: 1, 128>}, {transform_indices = @transform_5, window_bounds = array<i64: 8, 128>}]} {
    %c0 = arith.constant 0 : index
    %c0_0 = arith.constant 0 : index
    %0 = vector.load %arg1[%c0, %c0_0] : memref<8x128xf32, #tpu.memory_space<vmem>>, vector<8x128xf32>
    %1 = arith.truncf %0 : vector<8x128xf32> to vector<8x128xbf16>
    %c0_1 = arith.constant 0 : index
    %c0_2 = arith.constant 0 : index
    %2 = vector.load %arg2[%c0_1, %c0_2] : memref<128x128xbf16, #tpu.memory_space<vmem>>, vector<128x128xbf16>
    %cst = arith.constant dense<0.000000e+00> : vector<8x128xf32>
    %3 = tpu.matmul %1, %2, %cst {dimension_numbers = #tpu.dot_dimension_numbers<[1], [0], [0], [1], [0, 0, 1, 1], [], []>} : vector<8x128xbf16>, vector<128x128xbf16>, vector<8x128xf32> -> vector<8x128xf32>
    %c0_3 = arith.constant 0 : index
    %c0_4 = arith.constant 0 : index
    %4 = vector.load %arg3[%c0_3, %c0_4] : memref<1x128xf32, #tpu.memory_space<vmem>>, vector<1x128xf32>
    %5 = vector.broadcast %4 : vector<1x128xf32> to vector<8x128xf32>
    %6 = arith.addf %3, %5 : vector<8x128xf32>
    %cst_5 = arith.constant 5.000000e-01 : f32
    %7 = vector.broadcast %cst_5 : f32 to vector<8x128xf32>
    %8 = arith.mulf %7, %6 : vector<8x128xf32>
    %cst_6 = arith.constant 0.707106769 : f32
    %9 = vector.broadcast %cst_6 : f32 to vector<8x128xf32>
    %10 = arith.mulf %6, %9 : vector<8x128xf32>
    %11 = math.erf %10 : vector<8x128xf32>
    %cst_7 = arith.constant 1.000000e+00 : f32
    %12 = vector.broadcast %cst_7 : f32 to vector<8x128xf32>
    %13 = arith.addf %12, %11 : vector<8x128xf32>
    %14 = arith.mulf %8, %13 : vector<8x128xf32>
    %15 = arith.truncf %14 : vector<8x128xf32> to vector<8x128xbf16>
    %c0_8 = arith.constant 0 : index
    %c0_9 = arith.constant 0 : index
    %16 = vector.load %arg4[%c0_8, %c0_9] : memref<128x128xbf16, #tpu.memory_space<vmem>>, vector<128x128xbf16>
    %cst_10 = arith.constant dense<0.000000e+00> : vector<8x128xf32>
    %17 = tpu.matmul %15, %16, %cst_10 {dimension_numbers = #tpu.dot_dimension_numbers<[1], [0], [0], [1], [0, 0, 1, 1], [], []>} : vector<8x128xbf16>, vector<128x128xbf16>, vector<8x128xf32> -> vector<8x128xf32>
    %c0_11 = arith.constant 0 : index
    %c0_12 = arith.constant 0 : index
    %18 = vector.load %arg5[%c0_11, %c0_12] : memref<1x128xf32, #tpu.memory_space<vmem>>, vector<1x128xf32>
    %19 = vector.broadcast %18 : vector<1x128xf32> to vector<8x128xf32>
    %20 = arith.addf %17, %19 : vector<8x128xf32>
    %c0_13 = arith.constant 0 : index
    %c0_14 = arith.constant 0 : index
    %21 = vector.load %arg6[%c0_13, %c0_14] : memref<8x128xf32, #tpu.memory_space<vmem>>, vector<8x128xf32>
    tpu.vector_store %arg6[%c0_13, %c0_14], %20 {strides = array<i32>} : memref<8x128xf32, #tpu.memory_space<vmem>>, vector<8x128xf32>,
    return
  }
  func.func @transform_0(%arg0: i32) -> (i32, i32) {
    %c0_i32 = arith.constant 0 : i32
    %c0_i32_0 = arith.constant 0 : i32
    return %arg0, %c0_i32 : i32, i32
  }
  func.func @transform_1(%arg0: i32) -> (i32, i32) {
    %c0_i32 = arith.constant 0 : i32
    %c0_i32_0 = arith.constant 0 : i32
    %c0_i32_1 = arith.constant 0 : i32
    return %c0_i32, %c0_i32_0 : i32, i32
  }
  func.func @transform_2(%arg0: i32) -> (i32, i32) {
    %c0_i32 = arith.constant 0 : i32
    %c0_i32_0 = arith.constant 0 : i32
    %c0_i32_1 = arith.constant 0 : i32
    return %c0_i32, %c0_i32_0 : i32, i32
  }
  func.func @transform_3(%arg0: i32) -> (i32, i32) {
    %c0_i32 = arith.constant 0 : i32
    %c0_i32_0 = arith.constant 0 : i32
    %c0_i32_1 = arith.constant 0 : i32
    return %c0_i32, %c0_i32_0 : i32, i32
  }
  func.func @transform_4(%arg0: i32) -> (i32, i32) {
    %c0_i32 = arith.constant 0 : i32
    %c0_i32_0 = arith.constant 0 : i32
    %c0_i32_1 = arith.constant 0 : i32
    return %c0_i32, %c0_i32_0 : i32, i32
  }
  func.func @transform_5(%arg0: i32) -> (i32, i32) {
    %c0_i32 = arith.constant 0 : i32
    %c0_i32_0 = arith.constant 0 : i32
    return %arg0, %c0_i32 : i32, i32
  }
}

</mosaic_0001>

<bundles_post_ra>
// kernel: tpu_custom_call.1
= control target key start
LH: loop header
LB: loop body
LE: loop exit
PB: predicated region body
PF: predicated region fallthrough
CT: control target
= control target key end

     0   :  { %10 = vsyncpa [#allocation3], 0  ;;  %s1111_s0 = inlined_call_operand.hbm [shape: f32[16,128], index: 0, kind: input, shape index: {}]   ;;  %s1112_s1 = inlined_call_operand.hbm [shape: bf16[128,128], index: 1, kind: input, shape index: {}]   ;;  %s1113_s2 = inlined_call_operand.vmem [shape: f32[1,128], index: 2, kind: input, shape index: {}]   ;;  %s1114_s3 = inlined_call_operand.hbm [shape: bf16[128,128], index: 3, kind: input, shape index: {}]   ;;  %s1115_s4 = inlined_call_operand.vmem [shape: f32[1,128], index: 4, kind: input, shape index: {}]   ;;  %s1116_s5 = inlined_call_operand.hbm [shape: f32[16,128], index: 5, kind: output, shape index: {}]  }
   0x1   :  { %12 = vsyncpa [#allocation3 + $0x1], 0 }
   0x2   :  { %13 = vsyncpa [#allocation6], 0 }
   0x3   :  { %14 = vsyncpa [#allocation4], 0 }
   0x4   :  { %16 = vsyncpa [#allocation4 + $0x1], 0  ;;  %s956_s18 = smov 0   ;;  %s958_s19 = smov 0  }
   0x5   :  { %s960_s20 = smov 0   ;;  %s962_s21 = smov 0  }
   0x6 LB: > { %s174_s24 = sshll.u32 %s1112_s1, 4  ;;  %s980_s25 = sadd.s32 4294967295, %s920_s21   ;;  %s920_s21 = sphi %s962_s21, %s1127_s21   ;;  %s916_s20 = sphi %s960_s20, %s1126_s20   ;;  %s912_s19 = sphi %s958_s19, %s1125_s19   ;;  %s908_s18 = sphi %s956_s18, %s1124_s18   ;;  %s175_s24 = int_to_ptr.hbm [resolvable:$true] %s174_s24 }
   0x7   : > { %p591_p0 = scmp.ge.s32.totalorder %s920_s21, 1  ;;  %p43_p1 = scmp.eq.s32.totalorder %s980_s25, 0 }
   0x8   : > { %p163_p2 = scmp.lt.s32.totalorder %s920_s21, 3  ;;  %s922_s27 = smov [#allocation5]  }
   0x9   : > { %s176_s28 = sshll.u32 %s922_s27, 4  ;;  %s191_s6 = sshll.u32 %s1114_s3, 4  ;;  %s177_s28 = int_to_ptr.vmem [resolvable:$true] %s176_s28  ;;  %s192_s6 = int_to_ptr.hbm [resolvable:$true] %s191_s6 }
   0xa   : > { %p985_p3 = pnand %p591_p0, %p163_p2  ;;  %s923_s7 = smov [#allocation7]  }
   0xb   : > { %s193_s8 = sshll.u32 %s923_s7, 4  ;;  %s924_s9 = smov 64   ;;  %s194_s8 = int_to_ptr.vmem [resolvable:$true] %s193_s8 }
   0xc   : > { %p699_p4 = pneg %p985_p3  ;;  %s925_s10 = smov 4  }
   0xd   : > { %s590_s11 = sadd.s32 4294967294, %s920_s21   ;;  %s999_s12 = sadd.s32 1, %s920_s21  }
   0xe   : > { %p700_p6 = pnand %p699_p4, %p43_p1  ;;  %s26_s13 = ssub.s32 %s920_s21, %s999_s12 }
   0xf   : > { %s29_s14 = sadd.s32 1, %s916_s20  ;;  %p27_p7 = scmp.eq.s32.totalorder %s26_s13, 0 }
  0x10   : > { %702 = dma.hbm_to_vmem [thread:$0]  (!%p700_p6), %s175_s24, 1024, %s177_s28, [#allocation6], %s924_s9, %s924_s9, %s925_s10  }
  0x11   : > { %705 = dma.hbm_to_vmem [thread:$0]  (!%p700_p6), %s192_s6, 1024, %s194_s8, [#allocation6], %s924_s9, %s924_s9, %s925_s10  }
  0x12   : > { %p36_p8 = scmp.ne.s32.totalorder %s916_s20, %s912_s19  ;;  %p37_p9 = scmp.eq.s32.totalorder %s920_s21, 0 }
  0x13   : > { %p42_p10 = scmp.ne.s32.totalorder %s912_s19, %s908_s18  ;;  %p150_p13 = scmp.eq.s32.totalorder %s980_s25, 1 }
  0x14   : > { %s1010_s15 = scalar_select %p27_p7, %s916_s20, %s29_s14  }
  0x15   : > { %p1012_p11 = por %p37_p9, %p36_p8  ;;  %p1018_p12 = por %p43_p1, %p42_p10 }
  0x16   : > { %p156_p0 = scmp.eq.s32.totalorder %s590_s11, 1  ;;  %p716_p2 = scmp.lt.s32.totalorder %s920_s21, 2 }
  0x17   : > { %s210_s22 = sand.u32 1, %s916_s20   ;;  %p1025_p4 = por %p150_p13, %p36_p8 }
  0x18   : > { %p1029_p6 = por %p156_p0, %p42_p10  ;;  %s595_s27 = sshll.u32 %s210_s22, 3 }
  0x19   : > { %s596_s28 = sshll.u32 %s920_s21, 3  ;;  %s214_s7 = scalar_lea.vmem [#allocation2], %s595_s27 }
  0x1a   : > { %s218_s6 = scalar_lea.hbm %s1111_s0, %s596_s28  ;;  %s222_s8 = sshll.u32 %s214_s7, 4  ;;  %s223_s8 = int_to_ptr.vmem [resolvable:$true] %s222_s8 }
  0x1b   : > { %s220_s9 = sshll.u32 %s218_s6, 4  ;;  %p1039_p7 = pnand %p716_p2, %p1012_p11  ;;  %s221_s9 = int_to_ptr.hbm [resolvable:$true] %s220_s9 }
  0x1c   : > { %s211_s11 = scalar_lea.sflag [#allocation3], %s210_s22  ;;  %s820_s13 = sshra.s32 %s221_s9, 4  ;;  %s821_s13 = int_to_ptr.hbm [resolvable:$true] %s820_s13 }
  0x1d   : > { %s822_s14 = scalar_lea.hbm %s821_s13, 8  ;;  %p824_p9 = pneg %p1039_p7 }
  0x1e   : > { %p823_p8 = scmp.ne.s32.totalorder %s821_s13, %s822_s14  ;;  %s827_s29 = scalar_lea.hbm %s1111_s0, 16 }
  0x1f   : > { %p828_p11 = scmp.lt.s32.totalorder %s821_s13, %s1111_s0  ;;  %p829_p0 = scmp.lt.s32.totalorder %s827_s29, %s822_s14 }
  0x20   : > { %p825_p10 = pnand %p824_p9, %p823_p8 }
  0x21   : > { %p830_p2 = por %p829_p0, %p828_p11 }
  0x22   : > { %p826_p13 = pneg %p825_p10 }
  0x24   : > { %p831_p5 = pnand %p830_p2, %p826_p13 }
  0x26   : > { %834 = shalt.err (!%p831_p5)
}
  0x27   : > { %709 = dma.hbm_to_vmem [thread:$0]  (!%p1039_p7), %s221_s9, 128, %s223_s8, %s211_s11  }
  0x28   : > { %231 = sbr.rel (%p985_p3) target bundleno = 395 (0x18b), region = 40  ;;  %s1056_s22 = sand.u32 (!%p985_p3), 1, %s912_s19  }
  0x29   : > { %s598_s6 = sshll.u32 (!%p985_p3), %s1056_s22, 3  ;;  %s234_s7 = scalar_lea.sflag (!%p985_p3), [#allocation3], %s1056_s22 }
  0x2a   : > { %s237_s13 = scalar_lea.vmem (!%p985_p3), [#allocation2], %s598_s6 }
  0x2d   : > { %895 = dma.done.wait (%p1018_p12), %s234_s7, 128  }
  0x2e   : > { %897 = vsyncadd (%p1018_p12), %s234_s7, 4294967168 }
  0x2f   : > { %899 = dma.done.wait (%p43_p1), [#allocation6], 2048  }
  0x30   : > { %901 = vsyncadd (%p43_p1), [#allocation6], 4294965248  ;;  %v678_v0 = vld [vmem:[#allocation5 + $0x38] sm:$0xff]  ;;  %v677_v1 = vld [vmem:[#allocation5 + $0x30] sm:$0xff]  ;;  %s668_s8 = sshll.u32 %s980_s25, 3  ;;  %s274_s28 = scalar_lea.vmem [#allocation8], %s598_s6 }
  0x31   : > { %345 = vmatpush.bf16.msra.mxu0 %v678_v0  ;;  %v676_v2 = vld [vmem:[#allocation5 + $0x28] sm:$0xff]  ;;  %v675_v3 = vld [vmem:[#allocation5 + $0x20] sm:$0xff]  ;;  %v674_v4 = vld [vmem:[#allocation5 + $0x18] sm:$0xff]  ;;  %s496_s11 = scalar_lea.hbm %s1116_s5, %s668_s8  ;;  %s498_s29 = sshll.u32 %s274_s28, 4  ;;  %s499_s29 = int_to_ptr.vmem [resolvable:$true] %s498_s29 }
  0x32   : > { %v673_v5 = vld [vmem:[#allocation5 + $0x10] sm:$0xff]  ;;  %v672_v6 = vld [vmem:[#allocation5 + $0x8] sm:$0xff]  ;;  %v671_v7 = vld [vmem:[#allocation5] sm:$0xff]  ;;  %s500_s30 = sshll.u32 %s496_s11, 4  ;;  %s486_s16 = scalar_lea.sflag [#allocation4], %s1056_s22  ;;  %s501_s30 = int_to_ptr.hbm [resolvable:$true] %s500_s30 }
  0x33   : > { %v275_v8 = vld [vmem:[%s237_s13] sm:$0xff]  ;;  %v684_v13 = vld [vmem:[#allocation7 + $0x28] sm:$0xff]  ;;  %v683_v16 = vld [vmem:[#allocation7 + $0x20] sm:$0xff]  ;;  %s864_s25 = sshra.s32 %s501_s30, 4  ;;  %s870_s17 = scalar_lea.hbm %s1116_s5, 16  ;;  %s865_s25 = int_to_ptr.hbm [resolvable:$true] %s864_s25 }
  0x34   : > { %v276_v9 = vpack.c.bf16 %v275_v8, %v275_v8  ;;  %v686_v10 = vld [vmem:[#allocation7 + $0x38] sm:$0xff]  ;;  %v685_v11 = vld [vmem:[#allocation7 + $0x30] sm:$0xff]  ;;  %v680_v28 = vld [vmem:[#allocation7 + $0x8] sm:$0xff]  ;;  %s866_s7 = scalar_lea.hbm %s865_s25, 8  ;;  %p871_p12 = scmp.lt.s32.totalorder %s865_s25, %s1116_s5 }
  0x35   : > { %346 = vmatpush.bf16.msra.mxu0 %v677_v1  ;;  %471 = vmatpush.bf16.msra.mxu1 %v686_v10  ;;  %v756_v12 = vld [vmem:[%s1113_s2] ss:$0 sm:$0xff]  ;;  %v682_v19 = vld [vmem:[#allocation7 + $0x18] sm:$0xff]  ;;  %v679_v32 = vld [vmem:[#allocation7] sm:$0xff]  ;;  %p867_p1 = scmp.ne.s32.totalorder %s865_s25, %s866_s7  ;;  %p872_p7 = scmp.lt.s32.totalorder %s870_s17, %s866_s7 }
  0x36   : > { %v681_v23 = vld [vmem:[#allocation7 + $0x10] sm:$0xff] }
  0x37   : > { %v757_v62 = vld [vmem:[%s1115_s4] ss:$0 sm:$0xff]  ;;  %p868_p3 = pnand %p867_p1, %p1025_p4  ;;  %p873_p8 = por %p872_p7, %p871_p12 }
  0x39   : > { %347 = vmatpush.bf16.msra.mxu0 %v676_v2  ;;  %472 = vmatpush.bf16.msra.mxu1 %v685_v11  ;;  %p869_p5 = pneg %p868_p3 }
  0x3b   : > { %p874_p9 = pnand %p873_p8, %p869_p5 }
  0x3d   : > { %348 = vmatpush.bf16.msra.mxu0 %v675_v3  ;;  %473 = vmatpush.bf16.msra.mxu1 %v684_v13 }
  0x41   : > { %349 = vmatpush.bf16.msra.mxu0 %v674_v4  ;;  %474 = vmatpush.bf16.msra.mxu1 %v683_v16 }
  0x45   : > { %350 = vmatpush.bf16.msra.mxu0 %v673_v5  ;;  %475 = vmatpush.bf16.msra.mxu1 %v682_v19 }
  0x49   : > { %351 = vmatpush.bf16.msra.mxu0 %v672_v6  ;;  %476 = vmatpush.bf16.msra.mxu1 %v681_v23 }
  0x4d   : > { %352 = vmatpush.bf16.msra.mxu0 %v671_v7  ;;  %477 = vmatpush.bf16.msra.mxu1 %v680_v28 }
  0x50   : > { %353 = vmatmul.bf16.vlgmr.msra.gmra.mxu0 %v276_v9 }
  0x51   : > { %478 = vmatpush.bf16.msra.mxu1 %v679_v32 }
  0xcd   : > { %v354_v14 = vpop.f32.mrf.mxu0 }
  0xce   : > { %v355_v15 = vadd.f32 %v756_v12, %v354_v14 }
  0xd0   : > { %v359_v17 = vmul.f32 0.70710677, %v355_v15  ;;  %v358_v58 = vmul.f32 0.5, %v355_v15 }
  0xd2   : > { %v360_v18 = vmul.f32 %v359_v17, %v359_v17 }
  0xd4   : > { %v361_v20 = vmin.f32 %v360_v18, 16.0 }
  0xd5   : > { %v356_v21 = vpop.f32.mrf.mxu0 }
  0xd6   : > { %v362_v22 = vmul.f32 2.1237322e-06, %v361_v20  ;;  %v373_v24 = vmul.f32 3.8918573e-05, %v361_v20 }
  0xd8   : > { %v363_v25 = vadd.f32 0.00028619796, %v362_v22  ;;  %v374_v26 = vadd.f32 0.001143296, %v373_v24 }
  0xda   : > { %v364_v27 = vmul.f32 %v363_v25, %v361_v20  ;;  %v375_v29 = vmul.f32 %v374_v26, %v361_v20 }
  0xdc   : > { %v376_v30 = vadd.f32 0.014752088, %v375_v29  ;;  %v365_v31 = vadd.f32 0.0036580483, %v364_v27 }
  0xde   : > { %v377_v33 = vmul.f32 %v376_v30, %v361_v20  ;;  %v366_v35 = vmul.f32 %v365_v31, %v361_v20 }
  0xe0   : > { %v378_v34 = vadd.f32 0.112945676, %v377_v33  ;;  %v367_v38 = vadd.f32 0.05243302, %v366_v35 }
  0xe2   : > { %v379_v36 = vmul.f32 %v378_v34, %v361_v20  ;;  %v368_v41 = vmul.f32 %v367_v38, %v361_v20 }
  0xe4   : > { %v380_v37 = vadd.f32 0.4994258, %v379_v36  ;;  %v369_v42 = vadd.f32 0.18741608, %v368_v41 }
  0xe6   : > { %v381_v39 = vmul.f32 %v380_v37, %v361_v20  ;;  %v370_v44 = vmul.f32 %v369_v42, %v361_v20 }
  0xe8   : > { %v382_v40 = vadd.f32 1.0, %v381_v39  ;;  %v371_v48 = vadd.f32 1.1283791, %v370_v44 }
  0xea   : > { %758 = vrcp.f32 %v382_v40  ;;  %v394_v47 = vand.u32 2147483648, %v382_v40  ;;  %v392_v50 = vand.u32 2147483647, %v382_v40  ;;  %vm388_vm1 = vweird.f32 %v382_v40 }
  0xeb   : > { %v372_v53 = vmul.f32 %v371_v48, %v359_v17 }
  0xec   : > { %v395_v52 = vor.u32 1.1754944e-38, %v394_v47  ;;  %vm393_vm3 = vcmp.eq.f32.partialorder %v392_v50, 8.507059e+37 }
  0xf0   : > { %v759_v43 = vpop.eup %758 }
  0xf1   : > { %v384_v45 = vmul.f32 %v759_v43, %v382_v40  ;;  %vm389_vm0 = vweird.f32 %v759_v43 }
  0xf2   : > { %vm390_vm2 = vmor %vm388_vm1, %vm389_vm0 }
  0xf3   : > { %v385_v46 = vsub.f32 1.0, %v384_v45 }
  0xf5   : > { %v386_v49 = vmul.f32 %v759_v43, %v385_v46 }
  0xf7   : > { %v387_v51 = vadd.f32 %v759_v43, %v386_v49 }
  0xf9   : > { %v391_v54 = vsel %vm390_vm2, %v759_v43, %v387_v51 }
  0xfa   : > { %v396_v55 = vsel %vm393_vm3, %v395_v52, %v391_v54 }
  0xfb   : > { %v397_v56 = vmul.f32 %v396_v55, %v372_v53 }
  0xfd   : > { %v634_v57 = vclamps-f32 %v397_v56, 1.0 }
  0xff   : > { %v400_v59 = vadd.f32 1.0, %v634_v57 }
 0x101   : > { %v401_v60 = vmul.f32 %v400_v59, %v358_v58 }
 0x103   : > { %v402_v61 = vpack.c.bf16 %v401_v60, %v401_v60 }
 0x105   : > { %479 = vmatmul.bf16.vlgmr.msra.gmra.mxu1 %v402_v61 }
 0x182   : > { %v480_v63 = vpop.f32.mrf.mxu1 }
 0x183   : > { %v481_v0 = vadd.f32 %v757_v62, %v480_v63 }
 0x185   : > { %484 = vst [vmem:[%s274_s28] sm:$0xff] %v481_v0 }
 0x186   : > { %877 = shalt.err (!%p874_p9)
}
 0x187   : > { %697 = dma.vmem_to_hbm [thread:$0]  (%p1025_p4), %s499_s29, 128, %s501_s30, %s486_s16  }
 0x18a   : > { %v482_v1 = vpop.f32.mrf.mxu1 }
 0x18b PF: > { %s512_s22 = sand.u32 1, %s908_s18   ;;  %p1123_p10 = scmp.ge.s32.totalorder %s920_s21, 2 }
 0x18c   : > { %s513_s9 = scalar_lea.sflag [#allocation4], %s512_s22 }
 0x18d   : > { %p711_p13 = pnand %p1123_p10, %p1029_p6 }
 0x18f   : > { %p712_p11 = pneg %p711_p13 }
 0x191   : > { %903 = dma.done.wait (%p712_p11), %s513_s9, 128  }
 0x192   : > { %905 = vsyncadd (%p712_p11), %s513_s9, 4294967168  ;;  %p19_p0 = scmp.ge.s32.totalorder %s999_s12, 4   ;;  %s1124_s18 = smov %s912_s19 }
 0x193   : > { %s1125_s19 = smov %s916_s20  ;;  %s1126_s20 = smov %s1010_s15 }
 0x194   : > { %s1127_s21 = smov %s999_s12  ;;  %21 = sbr.rel (!%p19_p0) target bundleno = 6 (0x6), region = 93 }
 0x199   :  { %519 = vsyncpa [#allocation3], 1 }
 0x19a   :  { %521 = vsyncpa [#allocation3 + $0x1], 1 }
 0x19b   :  { %522 = vsyncpa [#allocation6], 1 }
 0x19c   :  { %523 = vsyncpa [#allocation4], 1 }
 0x19d   :  { %525 = vsyncpa [#allocation4 + $0x1], 1 }

</bundles_post_ra>
